<compile_context>
chip_gen: v7x
topology: tpu7x:2x2x1
jax: 0.10.0
libtpu: 0.0.40
codegen_flags: <defaults>
</compile_context>

<pallas_src>
import math

import jax
import jax.numpy as jnp
from jax.experimental import pallas as pl
from jax.experimental.pallas import tpu as pltpu


_LANE = 512        # lane-dense last block dim (multiple of 128)
_BLOCK_ROWS = 512  # max sublane rows per block -> 512*512*4B = 1 MiB per f32 operand


def _fused_dropsample_add_kernel(scales_ref, branch_ref, skip_ref, out_ref):
    """out = branch * scale[batch] + skip, one (1, rows_blk, lane) block per step."""
    b = pl.program_id(0)
    scale = scales_ref[b]  # f32 scalar read from SMEM (scalar prefetch)
    acc = branch_ref[...].astype(jnp.float32) * scale + skip_ref[...].astype(jnp.float32)
    out_ref[...] = acc.astype(out_ref.dtype)


def _fused_dropsample_add(branch, skip, scales):
    """dropsample(branch) + skip, with per-sample float32 `scales` of shape (B,)."""
    assert branch.shape == skip.shape and branch.dtype == skip.dtype
    orig_shape = skip.shape
    B = orig_shape[0]
    n = math.prod(orig_shape[1:])

    lane = _LANE if n >= _LANE else 128
    rows = pl.cdiv(n, lane)
    rows_blk = min(rows, _BLOCK_ROWS)
    rows_pad = pl.cdiv(rows, rows_blk) * rows_blk
    n_pad = rows_pad * lane

    def to_slab(a):
        a = a.reshape(B, n)
        if n_pad != n:
            a = jnp.pad(a, ((0, 0), (0, n_pad - n)))
        return a.reshape(B, rows_pad, lane)

    branch_s = to_slab(branch)
    skip_s = to_slab(skip)

    grid = (B, rows_pad // rows_blk)
    block = (1, rows_blk, lane)
    idx = lambda b, r, scales_ref: (b, r, 0)  # scalar-prefetch ref arrives positionally

    out = pl.pallas_call(
        _fused_dropsample_add_kernel,
        out_shape=jax.ShapeDtypeStruct((B, rows_pad, lane), skip.dtype),
        grid_spec=pltpu.PrefetchScalarGridSpec(
            num_scalar_prefetch=1,  # per-sample scales land in SMEM
            grid=grid,
            in_specs=[pl.BlockSpec(block, idx),
                      pl.BlockSpec(block, idx)],
            out_specs=pl.BlockSpec(block, idx),
        ),
        compiler_params=pltpu.CompilerParams(
            dimension_semantics=("parallel", "parallel"),  # megacore sharding on v7x
        ),
    )(scales.astype(jnp.float32), branch_s, skip_s)

    return out.reshape(B, n_pad)[:, :n].reshape(orig_shape)


def dropsample_scales(key, batch, prob, training=True):
    """Per-sample scale: (u > prob) / (1 - prob) in float32; ones on identity path."""
    if prob == 0.0 or not training:
        return jnp.ones((batch,), jnp.float32)
    u = jax.random.uniform(key, (batch,), dtype=jnp.float32)
    return jnp.where(u > prob, jnp.float32(1.0 / (1.0 - prob)), jnp.float32(0.0))


def mbconv_residual(x, *, fn, prob=0.0, key=None, training=True):
    """JAX/Pallas equivalent of MBConvResidual.forward: fn(x) -> dropsample -> + x."""
    # TODO(synk): `fn` (the MBConv conv branch) is an arbitrary submodule; it is
    # computed in plain JAX — only dropsample scaling + residual add are fused here.
    branch = fn(x)
    if key is None:
        key = jax.random.PRNGKey(0)
    scales = dropsample_scales(key, x.shape[0], prob, training)
    return _fused_dropsample_add(branch, x, scales)


if __name__ == "__main__":
    root = jax.random.PRNGKey(0)
    kx, kw, kd = jax.random.split(root, 3)

    B, C, H, W = 2, 4, 16, 16
    x = jax.random.normal(kx, (B, C, H, W), dtype=jnp.float32)

    # Stand-in for the MBConv branch `fn`: a fixed pointwise (1x1) conv.
    w = jax.random.normal(kw, (C, C), dtype=jnp.float32) * 0.1
    fn = lambda t: jnp.einsum("bchw,cd->bdhw", t, w)

    prob = 0.25

    # Training path: fused per-sample drop + residual add in the Pallas kernel.
    y = mbconv_residual(x, fn=fn, prob=prob, key=kd, training=True)
    y = jax.block_until_ready(y)
    assert y.shape == x.shape and y.dtype == x.dtype

    # Reference with the same precomputed scales (pure JAX).
    scales = dropsample_scales(kd, B, prob, training=True)
    branch = fn(x)
    ref = branch * scales[:, None, None, None] + x
    assert jnp.allclose(y, ref, rtol=1e-5, atol=1e-5), "fused kernel mismatch"

    # Each batch slice is either skip-only (dropped) or branch/(1-prob) + skip (kept).
    inv = 1.0 / (1.0 - prob)
    for b in range(B):
        ok_drop = bool(jnp.allclose(y[b], x[b], rtol=1e-6, atol=1e-6))
        ok_keep = bool(jnp.allclose(y[b], branch[b] * inv + x[b], rtol=1e-5, atol=1e-5))
        assert ok_drop or ok_keep, f"batch {b}: not a valid MBConvResidual output"

    # Identity dropsample paths (eval mode / prob == 0) still perform the residual add.
    y_eval = mbconv_residual(x, fn=fn, prob=prob, key=kd, training=False)
    y_p0 = mbconv_residual(x, fn=fn, prob=0.0, key=kd, training=True)
    y_id = branch + x
    assert bool(jnp.allclose(y_eval, y_id, rtol=1e-5, atol=1e-5))
    assert bool(jnp.allclose(y_p0, y_id, rtol=1e-5, atol=1e-5))

    print("KERNEL_OK")
</pallas_src>

<mosaic_0001>
module attributes {stable_mosaic.version = 11 : i64} {
  func.func @_fused_dropsample_add_kernel(%arg0: i32, %arg1: i32, %arg2: memref<2xf32, #tpu.memory_space<smem>>, %arg3: memref<1x2x512xf32, #tpu.memory_space<vmem>>, %arg4: memref<1x2x512xf32, #tpu.memory_space<vmem>>, %arg5: memref<1x2x512xf32, #tpu.memory_space<vmem>>) attributes {dimension_semantics = [#tpu.dimension_semantics<parallel>, #tpu.dimension_semantics<parallel>], iteration_bounds = array<i64: 2, 1>, scalar_prefetch = 1 : i64, scratch_operands = 0 : i64, tpu.core_type = #tpu.core_type<tc>, window_params = [{transform_indices = @transform_0, window_bounds = array<i64: 1, 2, 512>}, {transform_indices = @transform_1, window_bounds = array<i64: 1, 2, 512>}, {transform_indices = @transform_2, window_bounds = array<i64: 1, 2, 512>}]} {
    %0 = arith.index_cast %arg0 : i32 to index
    %1 = memref.load %arg2[%0] : memref<2xf32, #tpu.memory_space<smem>>
    %c0 = arith.constant 0 : index
    %c0_0 = arith.constant 0 : index
    %c0_1 = arith.constant 0 : index
    %2 = vector.load %arg3[%c0, %c0_0, %c0_1] : memref<1x2x512xf32, #tpu.memory_space<vmem>>, vector<1x2x512xf32>
    %3 = vector.broadcast %1 : f32 to vector<1x2x512xf32>
    %4 = arith.mulf %2, %3 : vector<1x2x512xf32>
    %c0_2 = arith.constant 0 : index
    %c0_3 = arith.constant 0 : index
    %c0_4 = arith.constant 0 : index
    %5 = vector.load %arg4[%c0_2, %c0_3, %c0_4] : memref<1x2x512xf32, #tpu.memory_space<vmem>>, vector<1x2x512xf32>
    %6 = arith.addf %4, %5 : vector<1x2x512xf32>
    %c0_5 = arith.constant 0 : index
    %c0_6 = arith.constant 0 : index
    %c0_7 = arith.constant 0 : index
    %7 = vector.load %arg5[%c0_5, %c0_6, %c0_7] : memref<1x2x512xf32, #tpu.memory_space<vmem>>, vector<1x2x512xf32>
    tpu.vector_store %arg5[%c0_5, %c0_6, %c0_7], %6 {strides = array<i32>} : memref<1x2x512xf32, #tpu.memory_space<vmem>>, vector<1x2x512xf32>,
    return
  }
  func.func @transform_0(%arg0: i32, %arg1: i32, %arg2: memref<2xf32, #tpu.memory_space<smem>>) -> (i32, i32, i32) {
    %c0_i32 = arith.constant 0 : i32
    %c0_i32_0 = arith.constant 0 : i32
    return %arg0, %arg1, %c0_i32 : i32, i32, i32
  }
  func.func @transform_1(%arg0: i32, %arg1: i32, %arg2: memref<2xf32, #tpu.memory_space<smem>>) -> (i32, i32, i32) {
    %c0_i32 = arith.constant 0 : i32
    %c0_i32_0 = arith.constant 0 : i32
    return %arg0, %arg1, %c0_i32 : i32, i32, i32
  }
  func.func @transform_2(%arg0: i32, %arg1: i32, %arg2: memref<2xf32, #tpu.memory_space<smem>>) -> (i32, i32, i32) {
    %c0_i32 = arith.constant 0 : i32
    %c0_i32_0 = arith.constant 0 : i32
    return %arg0, %arg1, %c0_i32 : i32, i32, i32
  }
}

</mosaic_0001>

<bundles_post_ra>
// kernel: tpu_custom_call.1
= control target key start
LH: loop header
LB: loop body
LE: loop exit
PB: predicated region body
PF: predicated region fallthrough
CT: control target
= control target key end

     0   :  { %s866_s0 = inlined_call_operand.hbm [shape: f32[2], index: 0, kind: input, shape index: {}]   ;;  %s867_s1 = inlined_call_operand.hbm [shape: f32[2,2,512], index: 1, kind: input, shape index: {}]   ;;  %s868_s2 = inlined_call_operand.hbm [shape: f32[2,2,512], index: 2, kind: input, shape index: {}]   ;;  %s869_s3 = inlined_call_operand.hbm [shape: f32[2,2,512], index: 3, kind: output, shape index: {}]  }
   0x1   :  { %s449_s14 = scalar_lea.hbm %s866_s0, 16 }
   0x2   :  { %p450_p0 = scmp.ne.s32.totalorder %s866_s0, %s449_s14  ;;  %p453_p1 = scmp.lt.u32.totalorder %s449_s14, %s866_s0 }
   0x4   :  { %p455_p2 = pnand %p453_p1, %p450_p0 }
   0x6   :  { %458 = shalt.err (!%p455_p2)  }
   0x7   :  { %s609_s19 = smov [#allocation3]  }
   0x8   :  { %9 = dma.hbm_to_smem %s866_s0, 16, %s609_s19, [#allocation2] }
   0x9   :  { %571 = dma.done.wait [#allocation2], 16 }
   0xa   :  { %572 = vsyncadd [#allocation2], 4294967280 }
   0xb   :  { %11 = sfence }
   0xc   :  { %12 = vsyncpa [#allocation5], 0 }
   0xd   :  { %14 = vsyncpa [#allocation5 + $0x1], 0 }
   0xe   :  { %15 = vsyncpa [#allocation8], 0 }
   0xf   :  { %17 = vsyncpa [#allocation8 + $0x1], 0 }
  0x10   :  { %18 = vsyncpa [#allocation6], 0 }
  0x11   :  { %20 = vsyncpa [#allocation6 + $0x1], 0  ;;  %s645_s22 = smov 0   ;;  %s647_s23 = smov 0  }
  0x12   :  { %s649_s24 = smov 0   ;;  %s651_s25 = smov 0  }
  0x13   :  { %s653_s26 = smov 0   ;;  %s655_s0 = smov 0  }
  0x14 LB: > { %s359_s27 = sadd.s32 4294967295, %s607_s0   ;;  %s360_s28 = sadd.s32 4294967294, %s607_s0   ;;  %s607_s0 = sphi %s655_s0, %s26_s0   ;;  %s603_s26 = sphi %s653_s26, %s889_s26   ;;  %s599_s25 = sphi %s651_s25, %s888_s25   ;;  %s595_s24 = sphi %s649_s24, %s887_s24   ;;  %s591_s23 = sphi %s647_s23, %s886_s23   ;;  %s587_s22 = sphi %s645_s22, %s885_s22  }
  0x15   : > { %s38_s29 = sadd.s32 1, %s603_s26  ;;  %s47_s30 = sadd.s32 1, %s595_s24 }
  0x16   : > { %p40_p3 = scmp.ge.s32.totalorder %s38_s29, 2  ;;  %p54_p4 = scmp.ne.s32.totalorder %s595_s24, %s591_s23 }
  0x17   : > { %p55_p5 = scmp.eq.s32.totalorder %s607_s0, 0  ;;  %p60_p6 = scmp.ne.s32.totalorder %s591_s23, %s587_s22 }
  0x18   : > { %s891_s29 = smov (%p40_p3, %s38_s29), 0  ;;  %p61_p8 = scmp.eq.s32.totalorder %s359_s27, 0 }
  0x19   : > { %p686_p7 = por %p55_p5, %p54_p4  ;;  %s42_s5 = ssub.s32 %s603_s26, %s891_s29 }
  0x1a   : > { %p114_p9 = scmp.eq.s32.totalorder %s359_s27, 1  ;;  %p45_p10 = scmp.eq.s32.totalorder %s42_s5, 0 }
  0x1b   : > { %p692_p11 = por %p61_p8, %p60_p6  ;;  %p120_p13 = scmp.eq.s32.totalorder %s360_s28, 1 }
  0x1c   : > { %p696_p12 = por %p114_p9, %p54_p4  ;;  %p398_p2 = scmp.lt.s32.totalorder %s607_s0, 2 }
  0x1d   : > { %s873_s6 = scalar_select %p692_p11, 1, 0 }
  0x1e   : > { %s874_s7 = scalar_select %p696_p12, 1, 0 }
  0x1f   : > { %s701_s8 = scalar_select %p45_p10, %s595_s24, %s47_s30  }
  0x20   : > { %p703_p0 = por %p120_p13, %p60_p6  ;;  %s710_s10 = sand.u32 1, %s595_s24  }
  0x21   : > { %s363_s11 = sshll.u32 %s710_s10, 3  ;;  %s378_s12 = sshll.u32 %s603_s26, 7 }
  0x22   : > { %s875_s9 = scalar_select %p703_p0, 1, 0 }
  0x23   : > { %s719_s15 = scalar_lea.hbm %s867_s1, %s378_s12  ;;  %s144_s16 = scalar_lea.vmem [#allocation4], %s363_s11 }
  0x24   : > { %s154_s17 = sshll.u32 %s144_s16, 4  ;;  %p727_p3 = pnand %p398_p2, %p686_p7  ;;  %s723_s17 = int_to_ptr.vmem [resolvable:$true] %s154_s17 }
  0x25   : > { %s141_s19 = scalar_lea.sflag [#allocation5], %s710_s10  ;;  %s459_s20 = scalar_lea.hbm %s719_s15, 128 }
  0x26   : > { %p460_p6 = scmp.ne.s32.totalorder %s719_s15, %s459_s20  ;;  %p461_p8 = pneg %p727_p3 }
  0x27   : > { %s464_s28 = scalar_lea.hbm %s867_s1, 256  ;;  %p465_p7 = scmp.lt.u32.totalorder %s719_s15, %s867_s1 }
  0x28   : > { %p462_p9 = pnand %p461_p8, %p460_p6  ;;  %p466_p13 = scmp.lt.u32.totalorder %s464_s28, %s459_s20 }
  0x29   : > { %p468_p1 = scmp.lt.u32.totalorder %s459_s20, %s719_s15 }
  0x2a   : > { %p463_p10 = pneg %p462_p9  ;;  %p467_p2 = por %p466_p13, %p465_p7 }
  0x2c   : > { %p469_p4 = por %p468_p1, %p467_p2 }
  0x2e   : > { %p470_p5 = pnand %p469_p4, %p463_p10 }
  0x30   : > { %473 = shalt.err (!%p470_p5)
}
  0x31   : > { %s474_s5 = scalar_lea.vmem %s723_s17, 128  ;;  %s610_s13 = smov [#allocation4]  }
  0x32   : > { %p475_p6 = scmp.ne.s32.totalorder %s723_s17, %s474_s5  ;;  %s479_s14 = sshll.u32 %s610_s13, 4  ;;  %s480_s14 = int_to_ptr.vmem [resolvable:$false] %s479_s14 }
  0x33   : > { %s481_s16 = scalar_lea.vmem %s480_s14, 256  ;;  %p482_p12 = scmp.lt.s32.totalorder %s723_s17, %s480_s14 }
  0x34   : > { %p477_p9 = pnand %p475_p6, %p461_p8  ;;  %p483_p7 = scmp.lt.s32.totalorder %s481_s16, %s474_s5 }
  0x36   : > { %p478_p0 = pneg %p477_p9  ;;  %p484_p13 = por %p483_p7, %p482_p12 }
  0x38   : > { %p485_p1 = pnand %p484_p13, %p478_p0 }
  0x3a   : > { %488 = shalt.err (!%p485_p1)
}
  0x3b   : > { %390 = dma.hbm_to_vmem [thread:$0]  (!%p727_p3), %s719_s15, 128, %s723_s17, %s141_s19  }
  0x3c   : > { %p877_p4 = scmp.lt.s32.totalorder %s607_s0, 3  ;;  %p878_p5 = scmp.ge.s32.totalorder %s607_s0, 1 }
  0x3d   : > { %s772_s28 = scalar_lea.hbm %s868_s2, %s378_s12  ;;  %s165_s30 = scalar_lea.vmem [#allocation7], %s363_s11 }
  0x3e   : > { %p763_p10 = pnand %p878_p5, %p877_p4  ;;  %s175_s4 = sshll.u32 %s165_s30, 4  ;;  %s176_s4 = int_to_ptr.vmem [resolvable:$true] %s175_s4 }
  0x3f   : > { %s162_s15 = scalar_lea.sflag [#allocation8], %s710_s10  ;;  %s489_s17 = scalar_lea.hbm %s772_s28, 128 }
  0x40   : > { %s879_s20 = scalar_select %p763_p10, 1, 0 }
  0x41   : > { %p490_p12 = scmp.ne.s32.totalorder %s772_s28, %s489_s17  ;;  %s494_s12 = scalar_lea.hbm %s868_s2, 256 }
  0x42   : > { %p495_p6 = scmp.lt.u32.totalorder %s772_s28, %s868_s2  ;;  %p496_p9 = scmp.lt.u32.totalorder %s494_s12, %s489_s17 }
  0x43   : > { %p492_p0 = pnand %p490_p12, %p461_p8  ;;  %p498_p13 = scmp.lt.u32.totalorder %s489_s17, %s772_s28 }
  0x44   : > { %p497_p7 = por %p496_p9, %p495_p6 }
  0x45   : > { %p493_p2 = pneg %p492_p0 }
  0x46   : > { %p499_p1 = por %p498_p13, %p497_p7 }
  0x48   : > { %p500_p4 = pnand %p499_p1, %p493_p2 }
  0x4a   : > { %503 = shalt.err (!%p500_p4)
}
  0x4b   : > { %s504_s10 = scalar_lea.vmem %s176_s4, 128  ;;  %s611_s11 = smov [#allocation7]  }
  0x4c   : > { %p505_p5 = scmp.ne.s32.totalorder %s176_s4, %s504_s10  ;;  %s509_s16 = sshll.u32 %s611_s11, 4  ;;  %s510_s16 = int_to_ptr.vmem [resolvable:$false] %s509_s16 }
  0x4d   : > { %s511_s21 = scalar_lea.vmem %s510_s16, 256  ;;  %p512_p11 = scmp.lt.s32.totalorder %s176_s4, %s510_s16 }
  0x4e   : > { %p507_p12 = pnand %p505_p5, %p461_p8  ;;  %p513_p10 = scmp.lt.s32.totalorder %s511_s21, %s504_s10 }
  0x50   : > { %p508_p0 = pneg %p507_p12  ;;  %p514_p6 = por %p513_p10, %p512_p11 }
  0x52   : > { %p515_p9 = pnand %p514_p6, %p508_p0 }
  0x54   : > { %518 = shalt.err (!%p515_p9)
}
  0x55   : > { %393 = dma.hbm_to_vmem [thread:$0]  (!%p727_p3), %s772_s28, 128, %s176_s4, %s162_s15  }
  0x56   : > { %p880_p2 = scmp.ne.s32.totalorder %s879_s20, 0 }
  0x57   : > { %s799_s27 = sand.u32 (!%p880_p2), 1, %s591_s23   ;;  %p881_p8 = scmp.ne.s32.totalorder (!%p880_p2), %s873_s6, 0 }
  0x58   : > { %184 = sbr.rel (%p880_p2) target bundleno = 124 (0x7c), region = 28  ;;  %s370_s30 = sshll.u32 (!%p880_p2), %s799_s27, 3 }
  0x59   : > { %s187_s17 = scalar_lea.sflag (!%p880_p2), [#allocation5], %s799_s27  ;;  %s190_s19 = scalar_lea.vmem (!%p880_p2), [#allocation4], %s370_s30 }
  0x5f   : > { %574 = dma.done.wait (%p881_p8), %s187_s17, 128  }
  0x60   : > { %576 = vsyncadd (%p881_p8), %s187_s17, 4294967168  ;;  %s196_s18 = scalar_lea.sflag [#allocation8], %s799_s27  ;;  %s199_s28 = scalar_lea.vmem [#allocation7], %s370_s30 }
  0x61   : > { %578 = dma.done.wait (%p881_p8), %s196_s18, 128  }
  0x62   : > { %580 = vsyncadd (%p881_p8), %s196_s18, 4294967168  ;;  %s225_s20 = sld [smem:[#allocation3 + %s599_s25]]  ;;  %v226_v0 = vld [vmem:[%s190_s19] sm:$0xff]  ;;  %v229_v2 = vld [vmem:[%s199_s28] sm:$0xff]  ;;  %s224_s4 = scalar_lea.vmem [#allocation9], %s370_s30 }
  0x63   : > { %s249_s15 = sshll.u32 %s224_s4, 4  ;;  %s380_s5 = sshll.u32 %s599_s25, 7  ;;  %s814_s15 = int_to_ptr.vmem [resolvable:$true] %s249_s15 }
  0x64   : > { %s819_s6 = scalar_lea.hbm %s869_s3, %s380_s5  ;;  %s233_s14 = scalar_lea.sflag [#allocation6], %s799_s27 }
  0x65   : > { %s519_s10 = scalar_lea.vmem %s814_s15, 128  ;;  %p882_p3 = scmp.ne.s32.totalorder %s874_s7, 0 }
  0x66   : > { %p520_p11 = scmp.ne.s32.totalorder %s814_s15, %s519_s10  ;;  %s612_s25 = smov [#allocation9]  }
  0x67   : > { %s523_s11 = sshll.u32 %s612_s25, 4  ;;  %s524_s11 = int_to_ptr.vmem [resolvable:$false] %s523_s11 }
  0x68   : > { %v227_v1 = vstv %s225_s20  ;;  %p521_p10 = pnand %p520_p11, %p882_p3  ;;  %s525_s16 = scalar_lea.vmem %s524_s11, 256 }
  0x69   : > { %v228_v3 = vmul.f32 %v227_v1, %v226_v0  ;;  %p526_p13 = scmp.lt.s32.totalorder %s814_s15, %s524_s11  ;;  %p527_p1 = scmp.lt.s32.totalorder %s525_s16, %s519_s10 }
  0x6a   : > { %p522_p7 = pneg %p521_p10 }
  0x6b   : > { %v230_v4 = vadd.f32 %v229_v2, %v228_v3  ;;  %p528_p4 = por %p527_p1, %p526_p13 }
  0x6d   : > { %231 = vst [vmem:[%s224_s4] sm:$0xff] %v230_v4  ;;  %p529_p5 = pnand %p528_p4, %p522_p7 }
  0x6f   : > { %532 = shalt.err (!%p529_p5)
}
  0x70   : > { %s533_s21 = scalar_lea.hbm %s819_s6, 128  ;;  %s537_s17 = scalar_lea.hbm %s869_s3, 256 }
  0x71   : > { %p534_p12 = scmp.ne.s32.totalorder %s819_s6, %s533_s21  ;;  %p538_p9 = scmp.lt.u32.totalorder %s819_s6, %s869_s3 }
  0x72   : > { %p539_p2 = scmp.lt.u32.totalorder %s537_s17, %s533_s21  ;;  %p541_p11 = scmp.lt.u32.totalorder %s533_s21, %s819_s6 }
  0x73   : > { %p535_p0 = pnand %p534_p12, %p882_p3 }
  0x74   : > { %p540_p8 = por %p539_p2, %p538_p9 }
  0x75   : > { %p536_p6 = pneg %p535_p0 }
  0x76   : > { %p542_p10 = por %p541_p11, %p540_p8 }
  0x78   : > { %p543_p7 = pnand %p542_p10, %p536_p6 }
  0x7a   : > { %546 = shalt.err (!%p543_p7)
}
  0x7b   : > { %385 = dma.vmem_to_hbm [thread:$0]  (%p882_p3), %s814_s15, 128, %s819_s6, %s233_s14  }
  0x7c PF: > { %s261_s28 = sand.u32 1, %s587_s22   ;;  %p883_p13 = scmp.ne.s32.totalorder %s875_s9, 0 }
  0x7d   : > { %p884_p1 = scmp.ge.s32.totalorder %s607_s0, 2  ;;  %s262_s20 = scalar_lea.sflag [#allocation6], %s261_s28 }
  0x7f   : > { %p395_p4 = pnand %p884_p1, %p883_p13 }
  0x81   : > { %582 = dma.done.wait (!%p395_p4), %s262_s20, 128  }
  0x82   : > { %584 = vsyncadd (!%p395_p4), %s262_s20, 4294967168  ;;  %s26_s0 = sadd.s32 1, %s607_s0   ;;  %s885_s22 = smov %s591_s23 }
  0x83   : > { %p23_p5 = scmp.ge.s32.totalorder %s26_s0, 4   ;;  %s886_s23 = smov %s595_s24 }
  0x84   : > { %s887_s24 = smov %s701_s8  ;;  %s888_s25 = smov %s603_s26 }
  0x85   : > { %s889_s26 = smov %s891_s29  ;;  %25 = sbr.rel (!%p23_p5) target bundleno = 20 (0x14), region = 86 }
  0x8c   :  { %267 = vsyncpa [#allocation5], 1 }
  0x8d   :  { %269 = vsyncpa [#allocation5 + $0x1], 1 }
  0x8e   :  { %270 = vsyncpa [#allocation8], 1 }
  0x8f   :  { %272 = vsyncpa [#allocation8 + $0x1], 1 }
  0x90   :  { %273 = vsyncpa [#allocation6], 1 }
  0x91   :  { %275 = vsyncpa [#allocation6 + $0x1], 1 }

</bundles_post_ra>
